<compile_context>
chip_gen: v5e
topology: v5e:2x2
jax: 0.10.0
libtpu: 0.0.40
codegen_flags: <defaults>
</compile_context>

<pallas_src>
import functools

import jax
import jax.numpy as jnp
from jax.experimental import pallas as pl
from jax.experimental.pallas import tpu as pltpu


def _round_up(x, m):
    return ((x + m - 1) // m) * m


def _vmem_capacity_bytes():
    try:
        info = pltpu.get_tpu_info()
        cap = getattr(info, "vmem_capacity_bytes", None)
        if cap:
            return int(cap)
    except Exception:
        pass
    return 64 * 1024 * 1024  # conservative (v7x) fallback


def _make_kernel(tile_h, precision):
    def ffn_kernel(x_ref, w13_ref, b13_ref, w2_ref, b2_ref, o_ref, acc_ref):
        # x_ref:   (TN, E_p)        compute dtype (resident across the H axis)
        # w13_ref: (E_p, 2*tile_h)  compute dtype   [w1 chunk | w3 chunk]
        # b13_ref: (1, 2*tile_h)    f32
        # w2_ref:  (tile_h, E_p)    compute dtype
        # b2_ref:  (1, E_p)         f32
        # acc_ref: (TN, E_p)        f32 scratch accumulator
        j = pl.program_id(1)

        @pl.when(j == 0)
        def _init():
            acc_ref[...] = jnp.zeros_like(acc_ref)

        x = x_ref[...]
        # Fused up-projection for this H chunk (single long MXU run).
        h = jnp.dot(x, w13_ref[...], preferred_element_type=jnp.float32,
                    precision=precision) + b13_ref[...]
        h1 = h[:, :tile_h]
        h3 = h[:, tile_h:]
        # SwiGLU gate in f32 (sigmoid -> EUP slot, free under MXU slack).
        g = (h1 * jax.nn.sigmoid(h1)) * h3
        # Down-projection partial sum for this H chunk.
        acc_ref[...] += jnp.dot(g.astype(w2_ref.dtype), w2_ref[...],
                                preferred_element_type=jnp.float32,
                                precision=precision)

        @pl.when(j == pl.num_programs(1) - 1)
        def _finalize():
            o_ref[...] = (acc_ref[...] + b2_ref[...]).astype(o_ref.dtype)

    return ffn_kernel


def prepare_params(params, *, compute_dtype=jnp.bfloat16, tile_h=None):
    """One-time pad/cast/fuse of the FFN weights (do NOT call per forward).

    Default compute_dtype is bfloat16 (MXU-native on all generations); gate math
    and accumulation stay f32 inside the kernel regardless."""
    compute_dtype = jnp.dtype(compute_dtype)
    E, H = params["w1t"].shape
    E_p = _round_up(E, 128)

    if tile_h is None:
        # Multiple of 512 matches the 2x256 MXU (v6e/v7x) and 4x128 (v5e);
        # for small H just use one lane-dense chunk.
        tile_h = 512 if H > 1024 else _round_up(H, 128)
    tile_h = _round_up(tile_h, 128)
    H_p = _round_up(H, tile_h)
    nH = H_p // tile_h

    def pad2(a, rows, cols, dt):
        a = jnp.asarray(a, dt)
        return jnp.pad(a, ((0, rows - a.shape[0]), (0, cols - a.shape[1])))

    # Fuse w1/w3 (and b1/b3) per H-chunk: chunk j of the fused array holds
    # [w1[:, j*th:(j+1)*th] | w3[:, j*th:(j+1)*th]] contiguously.
    w1p = pad2(params["w1t"], E_p, H_p, compute_dtype).reshape(E_p, nH, 1, tile_h)
    w3p = pad2(params["w3t"], E_p, H_p, compute_dtype).reshape(E_p, nH, 1, tile_h)
    w13 = jnp.concatenate([w1p, w3p], axis=2).reshape(E_p, 2 * H_p)
    b1p = pad2(params["b1"], 1, H_p, jnp.float32).reshape(1, nH, 1, tile_h)
    b3p = pad2(params["b3"], 1, H_p, jnp.float32).reshape(1, nH, 1, tile_h)
    b13 = jnp.concatenate([b1p, b3p], axis=2).reshape(1, 2 * H_p)

    w2p = pad2(params["w2t"], H_p, E_p, compute_dtype)
    b2p = pad2(params["b2"], 1, E_p, jnp.float32)

    return {
        "w13": w13, "b13": b13, "w2": w2p, "b2": b2p,
        "E": E, "H": H, "E_p": E_p, "H_p": H_p, "tile_h": tile_h,
        "compute_dtype": compute_dtype,
    }


def feed_forward(x, prepared, *, tile_n=None):
    """x: [..., E]; prepared: output of prepare_params (cached across calls)."""
    compute_dtype = prepared["compute_dtype"]
    E = prepared["E"]
    E_p, H_p, tile_h = prepared["E_p"], prepared["H_p"], prepared["tile_h"]
    io_bytes = compute_dtype.itemsize
    pack = 8 if io_bytes >= 4 else 32 // io_bytes  # sublane pack: 8 (f32) / 16 (bf16)

    orig_shape = x.shape
    x2d = x.reshape(-1, E).astype(compute_dtype)
    N = x2d.shape[0]

    vmem_cap = _vmem_capacity_bytes()
    if tile_n is None:
        big_vmem = vmem_cap >= 100 * 1024 * 1024          # v5e / v6e (128 MiB)
        tile_n = ((512 if big_vmem else 256) if io_bytes < 4
                  else (256 if big_vmem else 128))
    tile_n = max(pack, min(_round_up(tile_n, pack), _round_up(N, pack)))
    N_p = _round_up(N, tile_n)
    grid = (N_p // tile_n, H_p // tile_h)

    xp = jnp.pad(x2d, ((0, N_p - N), (0, E_p - E)))

    # f32 path: faithful full-precision MXU matmuls; bf16 path: native MXU.
    precision = (jax.lax.Precision.HIGHEST
                 if compute_dtype == jnp.float32 else None)

    # Per-step VMEM: double-buffered x/out tiles + streamed weight chunks,
    # f32 accumulator scratch, f32 intermediates (h, g) + g cast buffer.
    step_bytes = (
        2 * 2 * tile_n * E_p * io_bytes
        + 2 * (E_p * 2 * tile_h + tile_h * E_p) * io_bytes
        + 2 * 2 * (2 * tile_h + E_p) * 4
        + tile_n * E_p * 4
        + tile_n * (3 * tile_h) * 4
        + tile_n * tile_h * io_bytes
    )
    vmem_limit = min(max(32 * 1024 * 1024, int(1.3 * step_bytes)),
                     vmem_cap - 2 * 1024 * 1024)

    weight_bytes = (prepared["w13"].nbytes + prepared["w2"].nbytes
                    + prepared["b13"].nbytes + prepared["b2"].nbytes)
    cost = pl.CostEstimate(
        flops=int(6 * N_p * E_p * H_p),
        transcendentals=int(N_p * H_p),
        bytes_accessed=int(xp.nbytes + N_p * E_p * io_bytes
                           + weight_bytes * grid[0]),
    )

    kernel = _make_kernel(tile_h, precision)

    out = pl.pallas_call(
        kernel,
        out_shape=jax.ShapeDtypeStruct((N_p, E_p), compute_dtype),
        grid_spec=pltpu.PrefetchScalarGridSpec(
            num_scalar_prefetch=0,
            grid=grid,  # (token tiles: parallel, H chunks: arbitrary/reduction last)
            in_specs=[
                pl.BlockSpec((tile_n, E_p), lambda i, j: (i, 0)),      # x tile
                pl.BlockSpec((E_p, 2 * tile_h), lambda i, j: (0, j)),  # w1|w3 chunk
                pl.BlockSpec((1, 2 * tile_h), lambda i, j: (0, j)),    # b1|b3 chunk
                pl.BlockSpec((tile_h, E_p), lambda i, j: (j, 0)),      # w2 chunk
                pl.BlockSpec((1, E_p), lambda i, j: (0, 0)),           # b2
            ],
            out_specs=pl.BlockSpec((tile_n, E_p), lambda i, j: (i, 0)),
            scratch_shapes=[pltpu.VMEM((tile_n, E_p), jnp.float32)],   # f32 acc
        ),
        compiler_params=pltpu.CompilerParams(
            dimension_semantics=("parallel", "arbitrary"),
            vmem_limit_bytes=vmem_limit,
        ),
        cost_estimate=cost,
    )(xp, prepared["w13"], prepared["b13"], prepared["w2"], prepared["b2"])

    return out[:N, :E].reshape(orig_shape[:-1] + (E,))


def init_params(key, emb_dim, hidden_dim, dtype=jnp.float32):
    """Deterministic init mimicking nn.Linear (uniform in +/- 1/sqrt(fan_in))."""
    ks = jax.random.split(key, 6)

    def lin(kw, kb, fan_in, fan_out):
        bound = 1.0 / (fan_in ** 0.5)
        w = jax.random.uniform(kw, (fan_out, fan_in), dtype, -bound, bound)
        b = jax.random.uniform(kb, (fan_out,), dtype, -bound, bound)
        return w, b

    w1, b1 = lin(ks[0], ks[1], emb_dim, hidden_dim)
    w3, b3 = lin(ks[2], ks[3], emb_dim, hidden_dim)
    w2, b2 = lin(ks[4], ks[5], hidden_dim, emb_dim)

    return {
        "w1t": w1.T, "b1": b1.reshape(1, hidden_dim),
        "w3t": w3.T, "b3": b3.reshape(1, hidden_dim),
        "w2t": w2.T, "b2": b2.reshape(1, emb_dim),
    }


def feed_forward_ref(x, params):
    x2d = x.reshape(-1, x.shape[-1]).astype(jnp.float32)
    h1 = x2d @ params["w1t"].astype(jnp.float32) + params["b1"].astype(jnp.float32)
    h3 = x2d @ params["w3t"].astype(jnp.float32) + params["b3"].astype(jnp.float32)
    g = (h1 * jax.nn.sigmoid(h1)) * h3
    out = g @ params["w2t"].astype(jnp.float32) + params["b2"].astype(jnp.float32)
    return out.reshape(x.shape)


if __name__ == "__main__":
    B, S, E = 2, 8, 32
    H = 4 * E  # hidden_dim defaults to 4 * emb_dim
    key = jax.random.PRNGKey(0)
    kx, kp = jax.random.split(key)
    x = jax.random.normal(kx, (B, S, E), jnp.float32)
    params = init_params(kp, E, H, jnp.float32)

    ref = feed_forward_ref(x, params)

    # f32 path (precision=HIGHEST): tight tolerance.
    prep_f32 = prepare_params(params, compute_dtype=jnp.float32)
    out_f32 = jax.block_until_ready(feed_forward(x, prep_f32))
    assert out_f32.shape == (B, S, E) and out_f32.dtype == jnp.float32
    assert jnp.allclose(out_f32, ref, atol=1e-4, rtol=1e-4)

    # bf16 matmul path (default / performance configuration): loose tolerance.
    prep_bf16 = prepare_params(params, compute_dtype=jnp.bfloat16)
    out_bf16 = jax.block_until_ready(feed_forward(x, prep_bf16))
    assert out_bf16.shape == (B, S, E) and out_bf16.dtype == jnp.bfloat16
    assert jnp.allclose(out_bf16.astype(jnp.float32), ref, atol=1e-1, rtol=5e-2)

    print("KERNEL_OK")
</pallas_src>

<mosaic_0001>
module attributes {stable_mosaic.version = 11 : i64} {
  func.func @ffn_kernel(%arg0: i32, %arg1: i32, %arg2: memref<16x128xf32, #tpu.memory_space<vmem>>, %arg3: memref<128x256xf32, #tpu.memory_space<vmem>>, %arg4: memref<1x256xf32, #tpu.memory_space<vmem>>, %arg5: memref<128x128xf32, #tpu.memory_space<vmem>>, %arg6: memref<1x128xf32, #tpu.memory_space<vmem>>, %arg7: memref<16x128xf32, #tpu.memory_space<vmem>>, %arg8: memref<16x128xf32, #tpu.memory_space<vmem>>) attributes {dimension_semantics = [#tpu.dimension_semantics<parallel>, #tpu.dimension_semantics<arbitrary>], iteration_bounds = array<i64: 1, 1>, scalar_prefetch = 0 : i64, scratch_operands = 1 : i64, tpu.core_type = #tpu.core_type<tc>, window_params = [{transform_indices = @transform_0, window_bounds = array<i64: 16, 128>}, {transform_indices = @transform_1, window_bounds = array<i64: 128, 256>}, {transform_indices = @transform_2, window_bounds = array<i64: 1, 256>}, {transform_indices = @transform_3, window_bounds = array<i64: 128, 128>}, {pipeline_mode = #tpu.pipeline_mode<synchronous>, transform_indices = @transform_4, window_bounds = array<i64: 1, 128>}, {transform_indices = @transform_5, window_bounds = array<i64: 16, 128>}]} {
    %c0_i32 = arith.constant 0 : i32
    %0 = arith.cmpi eq, %arg1, %c0_i32 : i32
    %1 = arith.extui %0 : i1 to i32
    %c0_i32_0 = arith.constant 0 : i32
    %2 = arith.cmpi ne, %1, %c0_i32_0 : i32
    scf.if %2 {
      %cst_16 = arith.constant 0.000000e+00 : f32
      %26 = vector.broadcast %cst_16 : f32 to vector<16x128xf32>
      %c0_17 = arith.constant 0 : index
      %c0_18 = arith.constant 0 : index
      %27 = vector.load %arg8[%c0_17, %c0_18] : memref<16x128xf32, #tpu.memory_space<vmem>>, vector<16x128xf32>
      tpu.vector_store %arg8[%c0_17, %c0_18], %26 {strides = array<i32>} : memref<16x128xf32, #tpu.memory_space<vmem>>, vector<16x128xf32>,
    } else {
    }
    %c0 = arith.constant 0 : index
    %c0_1 = arith.constant 0 : index
    %3 = vector.load %arg2[%c0, %c0_1] : memref<16x128xf32, #tpu.memory_space<vmem>>, vector<16x128xf32>
    %c0_2 = arith.constant 0 : index
    %c0_3 = arith.constant 0 : index
    %4 = vector.load %arg3[%c0_2, %c0_3] : memref<128x256xf32, #tpu.memory_space<vmem>>, vector<128x256xf32>
    %cst = arith.constant dense<0.000000e+00> : vector<16x256xf32>
    %5 = tpu.matmul %3, %4, %cst {dimension_numbers = #tpu.dot_dimension_numbers<[1], [0], [0], [1], [0, 0, 1, 1], [], []>, precision = #tpu.contract_precision<fp32>} : vector<16x128xf32>, vector<128x256xf32>, vector<16x256xf32> -> vector<16x256xf32>
    %c0_4 = arith.constant 0 : index
    %c0_5 = arith.constant 0 : index
    %6 = vector.load %arg4[%c0_4, %c0_5] : memref<1x256xf32, #tpu.memory_space<vmem>>, vector<1x256xf32>
    %7 = vector.broadcast %6 : vector<1x256xf32> to vector<16x256xf32>
    %8 = arith.addf %5, %7 : vector<16x256xf32>
    %9 = vector.extract_strided_slice %8 {offsets = [0, 0], sizes = [16, 128], strides = [1, 1]} : vector<16x256xf32> to vector<16x128xf32>
    %10 = vector.extract_strided_slice %8 {offsets = [0, 128], sizes = [16, 128], strides = [1, 1]} : vector<16x256xf32> to vector<16x128xf32>
    %11 = arith.negf %9 : vector<16x128xf32>
    %12 = math.exp %11 : vector<16x128xf32>
    %cst_6 = arith.constant 1.000000e+00 : f32
    %13 = vector.broadcast %cst_6 : f32 to vector<16x128xf32>
    %14 = arith.addf %13, %12 : vector<16x128xf32>
    %15 = arith.divf %13, %14 : vector<16x128xf32>
    %16 = arith.mulf %9, %15 : vector<16x128xf32>
    %17 = arith.mulf %16, %10 : vector<16x128xf32>
    %c0_7 = arith.constant 0 : index
    %c0_8 = arith.constant 0 : index
    %18 = vector.load %arg8[%c0_7, %c0_8] : memref<16x128xf32, #tpu.memory_space<vmem>>, vector<16x128xf32>
    %c0_9 = arith.constant 0 : index
    %c0_10 = arith.constant 0 : index
    %19 = vector.load %arg5[%c0_9, %c0_10] : memref<128x128xf32, #tpu.memory_space<vmem>>, vector<128x128xf32>
    %cst_11 = arith.constant dense<0.000000e+00> : vector<16x128xf32>
    %20 = tpu.matmul %17, %19, %cst_11 {dimension_numbers = #tpu.dot_dimension_numbers<[1], [0], [0], [1], [0, 0, 1, 1], [], []>, precision = #tpu.contract_precision<fp32>} : vector<16x128xf32>, vector<128x128xf32>, vector<16x128xf32> -> vector<16x128xf32>
    %21 = arith.addf %18, %20 : vector<16x128xf32>
    %c0_12 = arith.constant 0 : index
    %c0_13 = arith.constant 0 : index
    %22 = vector.load %arg8[%c0_12, %c0_13] : memref<16x128xf32, #tpu.memory_space<vmem>>, vector<16x128xf32>
    tpu.vector_store %arg8[%c0_12, %c0_13], %21 {strides = array<i32>} : memref<16x128xf32, #tpu.memory_space<vmem>>, vector<16x128xf32>,
    %c0_i32_14 = arith.constant 0 : i32
    %23 = arith.cmpi eq, %arg1, %c0_i32_14 : i32
    %24 = arith.extui %23 : i1 to i32
    %c0_i32_15 = arith.constant 0 : i32
    %25 = arith.cmpi ne, %24, %c0_i32_15 : i32
    scf.if %25 {
      %c0_16 = arith.constant 0 : index
      %c0_17 = arith.constant 0 : index
      %26 = vector.load %arg8[%c0_16, %c0_17] : memref<16x128xf32, #tpu.memory_space<vmem>>, vector<16x128xf32>
      %c0_18 = arith.constant 0 : index
      %c0_19 = arith.constant 0 : index
      %27 = vector.load %arg6[%c0_18, %c0_19] : memref<1x128xf32, #tpu.memory_space<vmem>>, vector<1x128xf32>
      %28 = vector.broadcast %27 : vector<1x128xf32> to vector<16x128xf32>
      %29 = arith.addf %26, %28 : vector<16x128xf32>
      %c0_20 = arith.constant 0 : index
      %c0_21 = arith.constant 0 : index
      %30 = vector.load %arg7[%c0_20, %c0_21] : memref<16x128xf32, #tpu.memory_space<vmem>>, vector<16x128xf32>
      tpu.vector_store %arg7[%c0_20, %c0_21], %29 {strides = array<i32>} : memref<16x128xf32, #tpu.memory_space<vmem>>, vector<16x128xf32>,
    } else {
    }
    return
  }
  func.func @transform_0(%arg0: i32, %arg1: i32) -> (i32, i32) {
    %c0_i32 = arith.constant 0 : i32
    %c0_i32_0 = arith.constant 0 : i32
    return %arg0, %c0_i32 : i32, i32
  }
  func.func @transform_1(%arg0: i32, %arg1: i32) -> (i32, i32) {
    %c0_i32 = arith.constant 0 : i32
    %c0_i32_0 = arith.constant 0 : i32
    return %c0_i32, %arg1 : i32, i32
  }
  func.func @transform_2(%arg0: i32, %arg1: i32) -> (i32, i32) {
    %c0_i32 = arith.constant 0 : i32
    %c0_i32_0 = arith.constant 0 : i32
    return %c0_i32, %arg1 : i32, i32
  }
  func.func @transform_3(%arg0: i32, %arg1: i32) -> (i32, i32) {
    %c0_i32 = arith.constant 0 : i32
    %c0_i32_0 = arith.constant 0 : i32
    return %arg1, %c0_i32 : i32, i32
  }
  func.func @transform_4(%arg0: i32, %arg1: i32) -> (i32, i32) {
    %c0_i32 = arith.constant 0 : i32
    %c0_i32_0 = arith.constant 0 : i32
    %c0_i32_1 = arith.constant 0 : i32
    return %c0_i32, %c0_i32_0 : i32, i32
  }
  func.func @transform_5(%arg0: i32, %arg1: i32) -> (i32, i32) {
    %c0_i32 = arith.constant 0 : i32
    %c0_i32_0 = arith.constant 0 : i32
    return %arg0, %c0_i32 : i32, i32
  }
}

</mosaic_0001>

<bundles_post_ra>
// kernel: tpu_custom_call.1
= control target key start
LH: loop header
LB: loop body
LE: loop exit
PB: predicated region body
PF: predicated region fallthrough
CT: control target
= control target key end

     0   :  { %10 = vsyncpa [#allocation4], 0  ;;  %s2338_s0 = inlined_call_operand.hbm [shape: f32[16,128], index: 0, kind: input, shape index: {}]   ;;  %s2339_s1 = inlined_call_operand.hbm [shape: f32[128,256], index: 1, kind: input, shape index: {}]   ;;  %s2340_s2 = inlined_call_operand.hbm [shape: f32[1,256], index: 2, kind: input, shape index: {}]   ;;  %s2341_s3 = inlined_call_operand.hbm [shape: f32[128,128], index: 3, kind: input, shape index: {}]   ;;  %s2342_s4 = inlined_call_operand.vmem [shape: f32[1,128], index: 4, kind: input, shape index: {}]   ;;  %s2343_s5 = inlined_call_operand.hbm [shape: f32[16,128], index: 5, kind: output, shape index: {}]  }
   0x1   :  { %11 = vsyncpa [#allocation7], 0 }
   0x2   :  { %12 = vsyncpa [#allocation10], 0  ;;  %s31_s20 = sshll.u32 %s2339_s1, 4  ;;  %s32_s20 = int_to_ptr.hbm [resolvable:$true] %s31_s20 }
   0x3   :  { %13 = vsyncpa [#allocation5], 0  ;;  %s1522_s21 = smov [#allocation6]   ;;  %s18_s25 = sshll.u32 %s2338_s0, 4  ;;  %s19_s25 = int_to_ptr.hbm [resolvable:$true] %s18_s25 }
   0x4   :  { %s33_s22 = sshll.u32 %s1522_s21, 4  ;;  %s1523_s26 = smov 256   ;;  %s34_s22 = int_to_ptr.vmem [resolvable:$true] %s33_s22 }
   0x5   :  { %s1524_s27 = smov 16   ;;  %s1525_s28 = smov [#allocation3]  }
   0x6   :  { %39 = dma.hbm_to_vmem [thread:$0]  %s32_s20, 4096, %s34_s22, [#allocation7], %s1523_s26, %s1523_s26, %s1524_s27  }
   0x7   :  { %s20_s29 = sshll.u32 %s1525_s28, 4  ;;  %s1526_s30 = smov 128   ;;  %s21_s29 = int_to_ptr.vmem [resolvable:$true] %s20_s29 }
   0x8   :  { %s1527_s6 = smov 8   ;;  %s45_s8 = sshll.u32 %s2340_s2, 4  ;;  %s46_s8 = int_to_ptr.hbm [resolvable:$true] %s45_s8 }
   0x9   :  { %26 = dma.hbm_to_vmem [thread:$0]  %s19_s25, 256, %s21_s29, [#allocation4], %s1526_s30, %s1526_s30, %s1527_s6  }
   0xa   :  { %s1528_s9 = smov [#allocation8]   ;;  %s55_s12 = sshll.u32 %s2341_s3, 4  ;;  %s56_s12 = int_to_ptr.hbm [resolvable:$true] %s55_s12 }
   0xb   :  { %s47_s0 = sshll.u32 %s1528_s9, 4  ;;  %s1529_s13 = smov [#allocation9]   ;;  %s48_s0 = int_to_ptr.vmem [resolvable:$true] %s47_s0 }
   0xc   :  { %50 = dma.hbm_to_vmem [thread:$0]  %s46_s8, 32, %s48_s0, [#allocation7]  }
   0xd   :  { %s57_s14 = sshll.u32 %s1529_s13, 4  ;;  %s58_s14 = int_to_ptr.vmem [resolvable:$true] %s57_s14 }
   0xe   :  { %63 = dma.hbm_to_vmem [thread:$0]  %s56_s12, 2048, %s58_s14, [#allocation10], %s1526_s30, %s1526_s30, %s1527_s6  }
   0xf   :  { %1514 = dma.done.wait [#allocation4], 256  }
  0x10   :  { %1515 = vsyncadd [#allocation4], 4294967040 }
  0x11   :  { %1516 = dma.done.wait [#allocation7], 4128  }
  0x12   :  { %1517 = vsyncadd [#allocation7], 4294963168 }
  0x13   :  { %1518 = dma.done.wait [#allocation10], 2048  }
  0x14   :  { %1519 = vsyncadd [#allocation10], 4294965248  ;;  %v120_v0 = vld [vmem:[#allocation6 + $0xf0] sm:$0xff]  ;;  %v118_v1 = vld [vmem:[#allocation6 + $0xe0] sm:$0xff]  ;;  %s1530_s15 = smov [#allocation11]   ;;  %s1327_s19 = sshll.u32 %s2343_s5, 4  ;;  %s1328_s19 = int_to_ptr.hbm [resolvable:$true] %s1327_s19 }
  0x15   :  { %v116_v2 = vld [vmem:[#allocation6 + $0xd0] sm:$0xff]  ;;  %v1579_v3 = vand.u32 4294901760, %v120_v0  ;;  %v1581_v4 = vand.u32 4294901760, %v118_v1  ;;  %v114_v6 = vld [vmem:[#allocation6 + $0xc0] sm:$0xff]  ;;  %v121_v60 = vld [vmem:[#allocation6 + $0xf8] sm:$0xff]  ;;  %s1325_s16 = sshll.u32 %s1530_s15, 4  ;;  %s1326_s16 = int_to_ptr.vmem [resolvable:$true] %s1325_s16 }
  0x16   :  { %v1583_v5 = vand.u32 4294901760, %v116_v2  ;;  %v112_v7 = vld [vmem:[#allocation6 + $0xb0] sm:$0xff]  ;;  %v110_v8 = vld [vmem:[#allocation6 + $0xa0] sm:$0xff]  ;;  %v1585_v9 = vand.u32 4294901760, %v114_v6 }
  0x17   :  { %v1587_v10 = vand.u32 4294901760, %v112_v7  ;;  %v1589_v11 = vand.u32 4294901760, %v110_v8  ;;  %v108_v12 = vld [vmem:[#allocation6 + $0x90] sm:$0xff]  ;;  %v106_v13 = vld [vmem:[#allocation6 + $0x80] sm:$0xff]  ;;  %129 = vmatpush.msra.mxu0 %v1579_v3  ;;  %v1593_v14 = vsub.f32 %v120_v0, %v1579_v3  ;;  %v1596_v15 = vsub.f32 %v118_v1, %v1581_v4  ;;  %342 = vmatpush.msra.mxu3 %v1579_v3 }
  0x18   :  { %v1600_v16 = vsub.f32 %v116_v2, %v1583_v5  ;;  %v1602_v17 = vand.u32 4294901760, %v108_v12  ;;  %v1605_v18 = vsub.f32 %v114_v6, %v1585_v9  ;;  %v104_v21 = vld [vmem:[#allocation6 + $0x70] sm:$0xff]  ;;  %v1618_v25 = vand.u32 4294901760, %v106_v13  ;;  %v102_v26 = vld [vmem:[#allocation6 + $0x60] sm:$0xff]  ;;  %v119_v6 = vld [vmem:[#allocation6 + $0xe8] sm:$0xff] }
  0x19   :  { %v1608_v19 = vsub.f32 %v112_v7, %v1587_v10  ;;  %v1611_v20 = vsub.f32 %v110_v8, %v1589_v11  ;;  %131 = vmatpush.msra.mxu0 %v1581_v4  ;;  %284 = vmatpush.msra.mxu2 %v1593_v14  ;;  %v179_v22 = vand.u32 4294901760, %v1593_v14  ;;  %v2359_v23 = vand.u32 4294901760, %v1596_v15  ;;  %v100_v36 = vld [vmem:[#allocation6 + $0x50] sm:$0xff]  ;;  %v98_v42 = vld [vmem:[#allocation6 + $0x40] sm:$0xff] }
  0x1a   :  { %v2357_v24 = vand.u32 4294901760, %v1600_v16  ;;  %344 = vmatpush.msra.mxu3 %v1581_v4  ;;  %v2356_v27 = vand.u32 4294901760, %v1605_v18  ;;  %v1624_v29 = vsub.f32 %v108_v12, %v1602_v17  ;;  %v1637_v33 = vand.u32 4294901760, %v104_v21  ;;  %v96_v48 = vld [vmem:[#allocation6 + $0x30] sm:$0xff]  ;;  %v94_v54 = vld [vmem:[#allocation6 + $0x20] sm:$0xff] }
  0x1b   :  { %v2353_v28 = vand.u32 4294901760, %v1608_v19  ;;  %133 = vmatpush.msra.mxu0 %v1583_v5  ;;  %287 = vmatpush.msra.mxu2 %v1596_v15  ;;  %v180_v30 = vsub.f32 %v1593_v14, %v179_v22  ;;  %v186_v31 = vsub.f32 %v1596_v15, %v2359_v23  ;;  %v1640_v34 = vand.u32 4294901760, %v102_v26  ;;  %v92_v59 = vld [vmem:[#allocation6 + $0x10] sm:$0xff]  ;;  %v90_v2 = vld [vmem:[#allocation6] sm:$0xff] }
  0x1c   :  { %v192_v32 = vsub.f32 %v1600_v16, %v2357_v24  ;;  %346 = vmatpush.msra.mxu3 %v1583_v5  ;;  %v2352_v35 = vand.u32 4294901760, %v1611_v20  ;;  %v198_v39 = vsub.f32 %v1605_v18, %v2356_v27  ;;  %v1649_v40 = vsub.f32 %v106_v13, %v1618_v25 }
  0x1d   :  { %135 = vmatpush.msra.mxu0 %v1585_v9  ;;  %v181_v37 = vand.u32 4294901760, %v180_v30  ;;  %290 = vmatpush.msra.mxu2 %v1600_v16  ;;  %v187_v38 = vand.u32 4294901760, %v186_v31  ;;  %v204_v41 = vsub.f32 %v1608_v19, %v2353_v28  ;;  %v1656_v44 = vand.u32 4294901760, %v100_v36 }
  0x1e   :  { %348 = vmatpush.msra.mxu3 %v1585_v9  ;;  %v193_v43 = vand.u32 4294901760, %v192_v32  ;;  %v2350_v45 = vand.u32 4294901760, %v1624_v29  ;;  %v1660_v46 = vsub.f32 %v104_v21, %v1637_v33  ;;  %v210_v47 = vsub.f32 %v1611_v20, %v2352_v35  ;;  %v117_v32 = vld [vmem:[#allocation6 + $0xd8] sm:$0xff] }
  0x1f   :  { %137 = vmatpush.msra.mxu0 %v1587_v10  ;;  %182 = vmatpush.msra.mxu1 %v181_v37  ;;  %v199_v49 = vand.u32 4294901760, %v198_v39  ;;  %v1668_v50 = vand.u32 4294901760, %v98_v42  ;;  %v2348_v51 = vand.u32 4294901760, %v1649_v40  ;;  %v1672_v52 = vsub.f32 %v102_v26, %v1640_v34 }
  0x20   :  { %293 = vmatpush.msra.mxu2 %v1605_v18  ;;  %350 = vmatpush.msra.mxu3 %v1587_v10  ;;  %v205_v53 = vand.u32 4294901760, %v204_v41  ;;  %v216_v55 = vsub.f32 %v1624_v29, %v2350_v45  ;;  %v1680_v56 = vand.u32 4294901760, %v96_v48  ;;  %v2347_v57 = vand.u32 4294901760, %v1660_v46 }
  0x21   :  { %139 = vmatpush.msra.mxu0 %v1589_v11  ;;  %188 = vmatpush.msra.mxu1 %v187_v38  ;;  %v1684_v58 = vsub.f32 %v100_v36, %v1656_v44  ;;  %v211_v61 = vand.u32 4294901760, %v210_v47  ;;  %v222_v62 = vsub.f32 %v1649_v40, %v2348_v51  ;;  %v1692_v63 = vand.u32 4294901760, %v94_v54  ;;  %v88_v51 = vld [vmem:[#allocation3] sm:$0xff] }
  0x22   :  { %296 = vmatpush.msra.mxu2 %v1608_v19  ;;  %352 = vmatpush.msra.mxu3 %v1589_v11  ;;  %v2346_v0 = vand.u32 4294901760, %v1672_v52  ;;  %v1696_v1 = vsub.f32 %v98_v42, %v1668_v50  ;;  %v1700_v7 = vand.u32 4294901760, %v92_v59  ;;  %v1702_v8 = vand.u32 4294901760, %v121_v60 }
  0x23   :  { %141 = vmatpush.msra.mxu0 %v1602_v17  ;;  %194 = vmatpush.msra.mxu1 %v193_v43  ;;  %v217_v12 = vand.u32 4294901760, %v216_v55  ;;  %v228_v13 = vsub.f32 %v1660_v46, %v2347_v57  ;;  %v2345_v21 = vand.u32 4294901760, %v1684_v58  ;;  %v1710_v26 = vsub.f32 %v96_v48, %v1680_v56  ;;  %v115_v43 = vld [vmem:[#allocation6 + $0xc8] sm:$0xff] }
  0x24   :  { %299 = vmatpush.msra.mxu2 %v1611_v20  ;;  %354 = vmatpush.msra.mxu3 %v1602_v17  ;;  %v1714_v30 = vand.u32 4294901760, %v90_v2  ;;  %v1716_v31 = vand.u32 4294901760, %v119_v6  ;;  %v223_v36 = vand.u32 4294901760, %v222_v62  ;;  %v234_v37 = vsub.f32 %v1672_v52, %v2346_v0 }
  0x25   :  { %143 = vmatpush.msra.mxu0 %v1618_v25  ;;  %200 = vmatpush.msra.mxu1 %v199_v49  ;;  %v2344_v38 = vand.u32 4294901760, %v1696_v1  ;;  %v1724_v39 = vsub.f32 %v94_v54, %v1692_v63  ;;  %v1729_v41 = vsub.f32 %v92_v59, %v1700_v7  ;;  %v1732_v42 = vsub.f32 %v121_v60, %v1702_v8  ;;  %v113_v59 = vld [vmem:[#allocation6 + $0xb8] sm:$0xff] }
  0x26   :  { %302 = vmatpush.msra.mxu2 %v1624_v29  ;;  %356 = vmatpush.msra.mxu3 %v1618_v25  ;;  %2369 = vst [vmem:[#allocation16_spill] sm:$0xff] %v1714_v30  ;;  %v229_v47 = vand.u32 4294901760, %v228_v13  ;;  %v240_v48 = vsub.f32 %v1684_v58, %v2345_v21  ;;  %v2349_v49 = vand.u32 4294901760, %v1710_v26  ;;  %v1744_v54 = vsub.f32 %v90_v2, %v1714_v30  ;;  %v111_v13 = vld [vmem:[#allocation6 + $0xa8] sm:$0xff] }
  0x27   :  { %145 = vmatpush.msra.mxu0 %v1637_v33  ;;  %206 = vmatpush.msra.mxu1 %v205_v53  ;;  %2370 = vst [vmem:[#allocation17_spill] sm:$0xff] %v1716_v31  ;;  %v1739_v53 = vand.u32 4294901760, %v117_v32  ;;  %v1747_v55 = vsub.f32 %v119_v6, %v1716_v31  ;;  %v235_v60 = vand.u32 4294901760, %v234_v37  ;;  %v2351_v62 = vand.u32 4294901760, %v1724_v39 }
  0x28   :  { %305 = vmatpush.msra.mxu2 %v1649_v40  ;;  %358 = vmatpush.msra.mxu3 %v1637_v33  ;;  %v2355_v2 = vand.u32 4294901760, %v1729_v41  ;;  %v2354_v6 = vand.u32 4294901760, %v1732_v42  ;;  %v252_v37 = vsub.f32 %v1710_v26, %v2349_v49  ;;  %v1767_v21 = vand.u32 4294901760, %v113_v59 }
  0x29   :  { %147 = vmatpush.msra.mxu0 %v1640_v34  ;;  %212 = vmatpush.msra.mxu1 %v211_v61  ;;  %v246_v61 = vsub.f32 %v1696_v1, %v2344_v38  ;;  %v1765_v38 = vsub.f32 %v117_v32, %v1739_v53  ;;  %v2358_v0 = vand.u32 4294901760, %v1744_v54  ;;  %v2360_v57 = vand.u32 4294901760, %v1747_v55 }
  0x2a   :  { %308 = vmatpush.msra.mxu2 %v1660_v46  ;;  %360 = vmatpush.msra.mxu3 %v1640_v34  ;;  %v258_v32 = vsub.f32 %v1724_v39, %v2351_v62  ;;  %v1780_v49 = vand.u32 4294901760, %v111_v13  ;;  %v264_v45 = vsub.f32 %v1729_v41, %v2355_v2  ;;  %v1793_v35 = vsub.f32 %v113_v59, %v1767_v21 }
  0x2b   :  { %149 = vmatpush.msra.mxu0 %v1656_v44  ;;  %218 = vmatpush.msra.mxu1 %v217_v12  ;;  %v1754_v12 = vand.u32 4294901760, %v115_v43  ;;  %v2361_v62 = vand.u32 4294901760, %v1765_v38  ;;  %v1795_v28 = vand.u32 4294901760, %v88_v51  ;;  %v2371_v14 = vand.u32 4294901760, %v1596_v15  ;;  %v103_v15 = vld [vmem:[#allocation6 + $0x68] sm:$0xff] }
  0x2c   :  { %311 = vmatpush.msra.mxu2 %v1672_v52  ;;  %362 = vmatpush.msra.mxu3 %v1656_v44  ;;  %v259_v59 = vand.u32 4294901760, %v258_v32  ;;  %v1810_v24 = vsub.f32 %v111_v13, %v1780_v49 }
  0x2d   :  { %151 = vmatpush.msra.mxu0 %v1668_v50  ;;  %224 = vmatpush.msra.mxu1 %v223_v36  ;;  %v241_v36 = vand.u32 4294901760, %v240_v48  ;;  %v1778_v48 = vsub.f32 %v115_v43, %v1754_v12  ;;  %v253_v43 = vand.u32 4294901760, %v252_v37  ;;  %v107_v37 = vld [vmem:[#allocation6 + $0x88] sm:$0xff]  ;;  %v1821_v13 = vsub.f32 %v88_v51, %v1795_v28 }
  0x2e   :  { %314 = vmatpush.msra.mxu2 %v1684_v58  ;;  %364 = vmatpush.msra.mxu3 %v1668_v50  ;;  %v1823_v2 = vand.u32 4294901760, %v107_v37 }
  0x2f   :  { %153 = vmatpush.msra.mxu0 %v1680_v56  ;;  %230 = vmatpush.msra.mxu1 %v229_v47  ;;  %v247_v47 = vand.u32 4294901760, %v246_v61  ;;  %v109_v61 = vld [vmem:[#allocation6 + $0x98] sm:$0xff] }
  0x30   :  { %317 = vmatpush.msra.mxu2 %v1696_v1  ;;  %366 = vmatpush.msra.mxu3 %v1680_v56  ;;  %v1807_v27 = vand.u32 4294901760, %v109_v61 }
  0x31   :  { %155 = vmatpush.msra.mxu0 %v1692_v63  ;;  %236 = vmatpush.msra.mxu1 %v235_v60  ;;  %v552_v60 = vsub.f32 %v1732_v42, %v2354_v6  ;;  %v270_v6 = vsub.f32 %v1744_v54, %v2358_v0  ;;  %v265_v0 = vand.u32 4294901760, %v264_v45 }
  0x32   :  { %320 = vmatpush.msra.mxu2 %v1710_v26  ;;  %368 = vmatpush.msra.mxu3 %v1692_v63  ;;  %v1834_v51 = vsub.f32 %v109_v61, %v1807_v27  ;;  %v1848_v61 = vsub.f32 %v107_v37, %v1823_v2 }
  0x33   :  { %157 = vmatpush.msra.mxu0 %v1700_v7  ;;  %242 = vmatpush.msra.mxu1 %v241_v36  ;;  %v558_v36 = vsub.f32 %v1747_v55, %v2360_v57  ;;  %v553_v23 = vand.u32 4294901760, %v552_v60  ;;  %v105_v57 = vld [vmem:[#allocation6 + $0x78] sm:$0xff]  ;;  %v2372_v60 = vand.u32 4294901760, %v1778_v48 }
  0x34   :  { %323 = vmatpush.msra.mxu2 %v1724_v39  ;;  %370 = vmatpush.msra.mxu3 %v1700_v7  ;;  %v1836_v32 = vand.u32 4294901760, %v105_v57  ;;  %v2365_v37 = vand.u32 4294901760, %v1834_v51 }
  0x35   :  { %159 = vmatpush.msra.mxu0 %v1714_v30  ;;  %248 = vmatpush.msra.mxu1 %v247_v47  ;;  %v564_v47 = vsub.f32 %v1765_v38, %v2361_v62  ;;  %v559_v45 = vand.u32 4294901760, %v558_v36  ;;  %v2374_v36 = vand.u32 4294901760, %v1793_v35  ;;  %v2375_v62 = vand.u32 4294901760, %v1605_v18 }
  0x36   :  { %326 = vmatpush.msra.mxu2 %v1729_v41  ;;  %372 = vmatpush.msra.mxu3 %v1714_v30  ;;  %v2373_v30 = vand.u32 4294901760, %v1600_v16  ;;  %v1852_v16 = vand.u32 4294901760, %v103_v15  ;;  %v2377_v18 = vand.u32 4294901760, %v1608_v19 }
  0x37   :  { %389 = vmatpush.msrb.mxu0 %v179_v22  ;;  %254 = vmatpush.msra.mxu1 %v253_v43  ;;  %v271_v22 = vand.u32 4294901760, %v270_v6  ;;  %v570_v43 = vsub.f32 %v1778_v48, %v2372_v60  ;;  %v565_v6 = vand.u32 4294901760, %v564_v47  ;;  %v1845_v60 = vand.u32 4294901760, %v1821_v13 }
  0x38   :  { %329 = vmatpush.msra.mxu2 %v1744_v54  ;;  %554 = vmatpush.msrb.mxu3 %v553_v23  ;;  %v101_v23 = vld [vmem:[#allocation6 + $0x58] sm:$0xff]  ;;  %v2376_v47 = vand.u32 4294901760, %v1810_v24  ;;  %v1877_v19 = vsub.f32 %v103_v15, %v1852_v16 }
  0x39   :  { %393 = vmatpush.msrb.mxu0 %v2371_v14  ;;  %260 = vmatpush.msra.mxu1 %v259_v59  ;;  %v89_v14 = vld [vmem:[#allocation3 + $0x8] sm:$0xff]  ;;  %v576_v59 = vsub.f32 %v1793_v35, %v2374_v36 }
  0x3a   :  { %501 = vmatpush.msrb.mxu2 %v1702_v8  ;;  %560 = vmatpush.msrb.mxu3 %v559_v45  ;;  %v582_v36 = vsub.f32 %v1810_v24, %v2376_v47  ;;  %v163_v45 = vsub.f32 %v1821_v13, %v1845_v60  ;;  %v1871_v47 = vand.u32 4294901760, %v101_v23 }
  0x3b   :  { %397 = vmatpush.msrb.mxu0 %v2373_v30  ;;  %266 = vmatpush.msra.mxu1 %v265_v0  ;;  %v1854_v0 = vand.u32 4294901760, %v89_v14  ;;  %v571_v30 = vand.u32 4294901760, %v570_v43  ;;  %v2367_v43 = vand.u32 4294901760, %v1848_v61 }
  0x3c   :  { %503 = vmatpush.msrb.mxu2 %v1716_v31  ;;  %v1862_v31 = vsub.f32 %v105_v57, %v1836_v32  ;;  %566 = vmatpush.msrb.mxu3 %v565_v6  ;;  %v2378_v57 = vand.u32 4294901760, %v1611_v20  ;;  %v97_v6 = vld [vmem:[#allocation6 + $0x38] sm:$0xff]  ;;  %v1893_v15 = vand.u32 4294901760, %v163_v45 }
  0x3d   :  { %401 = vmatpush.msrb.mxu0 %v2375_v62  ;;  %272 = vmatpush.msra.mxu1 %v271_v22  ;;  %v99_v62 = vld [vmem:[#allocation6 + $0x48] sm:$0xff]  ;;  %v577_v22 = vand.u32 4294901760, %v576_v59  ;;  %v583_v59 = vand.u32 4294901760, %v582_v36  ;;  %v1901_v36 = vand.u32 4294901760, %v97_v6 }
  0x3e   :  { %505 = vmatpush.msrb.mxu2 %v1739_v53  ;;  %572 = vmatpush.msrb.mxu3 %v571_v30  ;;  %v2366_v20 = vand.u32 4294901760, %v1862_v31  ;;  %v1899_v30 = vsub.f32 %v101_v23, %v1871_v47 }
  0x3f   :  { %405 = vmatpush.msrb.mxu0 %v2377_v18  ;;  %460 = vmatpush.msrb.mxu1 %v1579_v3  ;;  %v1880_v3 = vsub.f32 %v89_v14, %v1854_v0  ;;  %v588_v18 = vsub.f32 %v1834_v51, %v2365_v37  ;;  %v594_v14 = vsub.f32 %v1848_v61, %v2367_v43  ;;  %v95_v37 = vld [vmem:[#allocation6 + $0x28] sm:$0xff] }
  0x40   :  { %507 = vmatpush.msrb.mxu2 %v1754_v12  ;;  %578 = vmatpush.msrb.mxu3 %v577_v22  ;;  %v600_v23 = vsub.f32 %v1862_v31, %v2366_v20  ;;  %v1926_v20 = vsub.f32 %v97_v6, %v1901_v36 }
  0x41   :  { %409 = vmatpush.msrb.mxu0 %v2378_v57  ;;  %462 = vmatpush.msrb.mxu1 %v1581_v4  ;;  %v1887_v57 = vand.u32 4294901760, %v99_v62  ;;  %v2379_v4 = vand.u32 4294901760, %v1624_v29  ;;  %v2380_v29 = vand.u32 4294901760, %v1649_v40  ;;  %v1908_v22 = vand.u32 4294901760, %v1880_v3 }
  0x42   :  { %509 = vmatpush.msrb.mxu2 %v1767_v21  ;;  %584 = vmatpush.msrb.mxu3 %v583_v59  ;;  %v589_v45 = vand.u32 4294901760, %v588_v18  ;;  %v2381_v40 = vand.u32 4294901760, %v1660_v46  ;;  %v595_v59 = vand.u32 4294901760, %v594_v14  ;;  %v611_v18 = vand.u32 4294901760, %v1899_v30 }
  0x43   :  { %413 = vmatpush.msrb.mxu0 %v2379_v4  ;;  %464 = vmatpush.msrb.mxu1 %v1583_v5  ;;  %v2368_v5 = vand.u32 4294901760, %v1877_v19  ;;  %v1915_v4 = vsub.f32 %v99_v62, %v1887_v57  ;;  %v2382_v62 = vand.u32 4294901760, %v1672_v52  ;;  %v171_v46 = vsub.f32 %v1880_v3, %v1908_v22 }
  0x44   :  { %511 = vmatpush.msrb.mxu2 %v1780_v49  ;;  %165 = vmatmul.f32.vlgmr.msra.gmra.mxu0 %v1893_v15  ;;  %v601_v14 = vand.u32 4294901760, %v600_v23  ;;  %v2383_v52 = vand.u32 4294901760, %v1684_v58  ;;  %v623_v23 = vand.u32 4294901760, %v1926_v20 }
  0x45   :  { %417 = vmatpush.msrb.mxu0 %v2380_v29  ;;  %466 = vmatpush.msrb.mxu1 %v1585_v9  ;;  %v1920_v9 = vand.u32 4294901760, %v95_v37  ;;  %v93_v29 = vld [vmem:[#allocation6 + $0x18] sm:$0xff]  ;;  %v617_v6 = vand.u32 4294901760, %v1915_v4  ;;  %v1956_v58 = vand.u32 4294901760, %v171_v46 }
  0x46   :  { %513 = vmatpush.msrb.mxu2 %v1807_v27  ;;  %590 = vmatpush.msrb.mxu3 %v589_v45  ;;  %v1938_v43 = vand.u32 4294901760, %v93_v29  ;;  %v612_v45 = vsub.f32 %v1899_v30, %v611_v18 }
  0x47   :  { %421 = vmatpush.msrb.mxu0 %v2381_v40  ;;  %468 = vmatpush.msrb.mxu1 %v1587_v10  ;;  %v606_v10 = vsub.f32 %v1877_v19, %v2368_v5  ;;  %v91_v40 = vld [vmem:[#allocation6 + $0x8] sm:$0xff]  ;;  %v2384_v5 = vand.u32 4294901760, %v1696_v1  ;;  %v2385_v1 = vand.u32 4294901760, %v1710_v26  ;;  %v2386_v26 = vand.u32 4294901760, %v1724_v39 }
  0x48   :  { %515 = vmatpush.msrb.mxu2 %v1823_v2  ;;  %596 = vmatpush.msrb.mxu3 %v595_v59  ;;  %v1963_v59 = vsub.f32 %v93_v29, %v1938_v43 }
  0x49   :  { %425 = vmatpush.msrb.mxu0 %v2382_v62  ;;  %470 = vmatpush.msrb.mxu1 %v1589_v11  ;;  %v1944_v11 = vsub.f32 %v95_v37, %v1920_v9  ;;  %v1951_v62 = vand.u32 4294901760, %v91_v40  ;;  %v618_v37 = vsub.f32 %v1915_v4, %v617_v6 }
  0x4a   :  { %517 = vmatpush.msrb.mxu2 %v1836_v32  ;;  %602 = vmatpush.msrb.mxu3 %v601_v14  ;;  %v2387_v14 = vand.u32 4294901760, %v1729_v41 }
  0x4b   :  { %429 = vmatpush.msrb.mxu0 %v2383_v52  ;;  %472 = vmatpush.msrb.mxu1 %v1602_v17  ;;  %v607_v17 = vand.u32 4294901760, %v606_v10  ;;  %v624_v10 = vsub.f32 %v1926_v20, %v623_v23  ;;  %v1975_v46 = vsub.f32 %v91_v40, %v1951_v62  ;;  %v619_v29 = vand.u32 4294901760, %v618_v37  ;;  %v2391_v37 = vld [vmem:[#allocation16_spill] sm:$0xff] }
  0x4c   :  { %519 = vmatpush.msrb.mxu2 %v1852_v16  ;;  %274 = vmatmul.f32.vlgmr.msra.gmra.mxu1 %v1795_v28 }
  0x4d   :  { %433 = vmatpush.msrb.mxu0 %v2384_v5  ;;  %474 = vmatpush.msrb.mxu1 %v1618_v25  ;;  %v629_v25 = vand.u32 4294901760, %v1944_v11  ;;  %v613_v5 = vand.u32 4294901760, %v612_v45  ;;  %v625_v52 = vand.u32 4294901760, %v624_v10  ;;  %v641_v45 = vand.u32 4294901760, %v1975_v46 }
  0x4e   :  { %332 = vmatmul.f32.vlgmr.msra.gmra.mxu2 %v1821_v13  ;;  %608 = vmatpush.msrb.mxu3 %v607_v17  ;;  %v2390_v17 = vand.u32 4294901760, %v1747_v55 }
  0x4f   :  { %437 = vmatpush.msrb.mxu0 %v2385_v1  ;;  %476 = vmatpush.msrb.mxu1 %v1637_v33  ;;  %v635_v33 = vand.u32 4294901760, %v1963_v59  ;;  %v630_v40 = vsub.f32 %v1944_v11, %v629_v25 }
  0x50   :  { %521 = vmatpush.msrb.mxu2 %v1871_v47  ;;  %173 = vmatmul.f32.gmra.mxu0 %v1956_v58 }
  0x51   :  { %376 = vmatmul.f32.vlgmr.msra.gmra.mxu3 %v1845_v60  ;;  %441 = vmatpush.msrb.mxu0 %v2386_v26  ;;  %v636_v39 = vsub.f32 %v1963_v59, %v635_v33  ;;  %v631_v41 = vand.u32 4294901760, %v630_v40 }
  0x52   :  { %478 = vmatpush.msrb.mxu1 %v1640_v34  ;;  %523 = vmatpush.msrb.mxu2 %v1887_v57  ;;  %v2388_v34 = vand.u32 4294901760, %v1744_v54 }
  0x53   :  { %614 = vmatpush.msrb.mxu3 %v613_v5  ;;  %445 = vmatpush.msrb.mxu0 %v2387_v14  ;;  %v637_v54 = vand.u32 4294901760, %v636_v39 }
  0x54   :  { %480 = vmatpush.msrb.mxu1 %v1656_v44  ;;  %525 = vmatpush.msrb.mxu2 %v1901_v36  ;;  %v642_v44 = vsub.f32 %v1975_v46, %v641_v45 }
  0x55   :  { %620 = vmatpush.msrb.mxu3 %v619_v29  ;;  %449 = vmatpush.msrb.mxu0 %v2388_v34  ;;  %v2168_v34 = vld [vmem:[#allocation8] sm:$0x3] }
  0x56   :  { %482 = vmatpush.msrb.mxu1 %v1668_v50  ;;  %527 = vmatpush.msrb.mxu2 %v1920_v9  ;;  %v643_v50 = vand.u32 4294901760, %v642_v44 }
  0x57   :  { %626 = vmatpush.msrb.mxu3 %v625_v52  ;;  %278 = vmatmul.f32.gmra.mxu1 %v1854_v0 }
  0x58   :  { %656 = vmatpush.msra.mxu0 %v1732_v42  ;;  %337 = vmatmul.f32.gmra.mxu2 %v1880_v3 }
  0x59   :  { %484 = vmatpush.msrb.mxu1 %v1680_v56  ;;  %529 = vmatpush.msrb.mxu2 %v1938_v43  ;;  %v2389_v56 = vand.u32 4294901760, %v1732_v42  ;;  %v2394_v42 = vand.u32 4294901760, %v1778_v48 }
  0x5a   :  { %632 = vmatpush.msrb.mxu3 %v631_v41  ;;  %659 = vmatpush.msra.mxu0 %v1747_v55  ;;  %v2395_v55 = vand.u32 4294901760, %v1793_v35 }
  0x5b   :  { %382 = vmatmul.f32.gmra.mxu3 %v1908_v22  ;;  %451 = vmatmul.f32.vlgmr.msrb.gmra.mxu0 %v1795_v28 }
  0x5c   :  { %486 = vmatpush.msrb.mxu1 %v1692_v63  ;;  %531 = vmatpush.msrb.mxu2 %v1951_v62  ;;  %v2392_v63 = vand.u32 4294901760, %v1765_v38 }
  0x5d   :  { %638 = vmatpush.msrb.mxu3 %v637_v54  ;;  %662 = vmatpush.msra.mxu0 %v1765_v38  ;;  %v2400_v38 = vand.u32 4294901760, %v1877_v19 }
  0x5e   :  { %761 = vmatpush.msra.mxu2 %v2389_v56  ;;  %488 = vmatpush.msrb.mxu1 %v1700_v7  ;;  %v2393_v7 = vld [vmem:[#allocation17_spill] sm:$0xff]  ;;  %v921_v56 = vld [vmem:[#allocation9 + $0x28] sm:$0xff] }
  0x5f   :  { %644 = vmatpush.msrb.mxu3 %v643_v50  ;;  %665 = vmatpush.msra.mxu0 %v1778_v48 }
  0x60   :  { %765 = vmatpush.msra.mxu2 %v2390_v17  ;;  %490 = vmatpush.msrb.mxu1 %v2391_v37 }
  0x61   :  { %832 = vmatpush.msra.mxu3 %v1702_v8  ;;  %668 = vmatpush.msra.mxu0 %v1793_v35  ;;  %v2397_v35 = vand.u32 4294901760, %v1834_v51 }
  0x62   :  { %492 = vmatmul.f32.vlgmr.msrb.gmra.mxu1 %v1795_v28  ;;  %769 = vmatpush.msra.mxu2 %v2392_v63 }
  0x63   :  { %714 = vmatpush.msra.mxu1 %v1702_v8  ;;  %834 = vmatpush.msra.mxu3 %v2393_v7  ;;  %v2396_v8 = vand.u32 4294901760, %v1810_v24 }
  0x64   :  { %671 = vmatpush.msra.mxu0 %v1810_v24  ;;  %773 = vmatpush.msra.mxu2 %v2394_v42  ;;  %v2398_v24 = vand.u32 4294901760, %v1848_v61  ;;  %v124_v42 = vperm.slane %v2168_v34, 0 }
  0x65   :  { %716 = vmatpush.msra.mxu1 %v2393_v7  ;;  %836 = vmatpush.msra.mxu3 %v1739_v53  ;;  %v2179_v7 = vand.u32 4294901760, %v921_v56 }
  0x66   :  { %455 = vmatmul.f32.gmra.mxu0 %v1854_v0  ;;  %777 = vmatpush.msra.mxu2 %v2395_v55 }
  0x67   :  { %674 = vmatpush.msra.mxu0 %v1834_v51  ;;  %718 = vmatpush.msra.mxu1 %v1739_v53 }
  0x68   :  { %838 = vmatpush.msra.mxu3 %v1754_v12  ;;  %781 = vmatpush.msra.mxu2 %v2396_v8  ;;  %v920_v8 = vld [vmem:[#allocation9 + $0x20] sm:$0xff] }
  0x69   :  { %677 = vmatpush.msra.mxu0 %v1848_v61  ;;  %720 = vmatpush.msra.mxu1 %v1754_v12 }
  0x6a   :  { %840 = vmatpush.msra.mxu3 %v1767_v21  ;;  %496 = vmatmul.f32.gmra.mxu1 %v1854_v0 }
  0x6b   :  { %680 = vmatpush.msra.mxu0 %v1862_v31  ;;  %722 = vmatpush.msra.mxu1 %v1767_v21  ;;  %v2399_v21 = vand.u32 4294901760, %v1862_v31 }
  0x6c   :  { %785 = vmatpush.msra.mxu2 %v2397_v35  ;;  %842 = vmatpush.msra.mxu3 %v1780_v49 }
  0x6d   :  { %683 = vmatpush.msra.mxu0 %v1877_v19  ;;  %724 = vmatpush.msra.mxu1 %v1780_v49  ;;  %v930_v49 = vld [vmem:[#allocation9 + $0x70] sm:$0xff] }
  0x6e   :  { %789 = vmatpush.msra.mxu2 %v2398_v24  ;;  %844 = vmatpush.msra.mxu3 %v1807_v27  ;;  %v2110_v12 = vand.u32 4294901760, %v930_v49 }
  0x6f   :  { %537 = vmatmul.f32.vlgmr.msrb.gmra.mxu2 %v1893_v15  ;;  %686 = vmatpush.msra.mxu0 %v1899_v30 }
  0x70   :  { %726 = vmatpush.msra.mxu1 %v1807_v27  ;;  %793 = vmatpush.msra.mxu2 %v2399_v21  ;;  %v931_v27 = vld [vmem:[#allocation9 + $0x78] sm:$0xff]  ;;  %v988_v48 = vsub.f32 %v930_v49, %v2110_v12  ;;  %v2192_v49 = vand.u32 4294901760, %v920_v8 }
  0x71   :  { %846 = vmatpush.msra.mxu3 %v1823_v2  ;;  %689 = vmatpush.msra.mxu0 %v1915_v4  ;;  %v2107_v31 = vand.u32 4294901760, %v931_v27 }
  0x72   :  { %646 = vmatmul.f32.vlgmr.msrb.gmra.mxu3 %v1795_v28  ;;  %728 = vmatpush.msra.mxu1 %v1823_v2 }
  0x73   :  { %797 = vmatpush.msra.mxu2 %v2400_v38  ;;  %848 = vmatpush.msra.mxu3 %v1836_v32  ;;  %v982_v53 = vsub.f32 %v931_v27, %v2107_v31  ;;  %v1042_v38 = vsub.f32 %v921_v56, %v2179_v7 }
  0x74   :  { %692 = vmatpush.msra.mxu0 %v1926_v20  ;;  %730 = vmatpush.msra.mxu1 %v1836_v32 }
  0x75   :  { %801 = vmatpush.msra.mxu2 %v611_v18  ;;  %850 = vmatpush.msra.mxu3 %v1852_v16  ;;  %v2114_v2 = vand.u32 4294901760, %v982_v53 }
  0x76   :  { %695 = vmatpush.msra.mxu0 %v1944_v11  ;;  %732 = vmatpush.msra.mxu1 %v1852_v16 }
  0x77   :  { %805 = vmatpush.msra.mxu2 %v617_v6  ;;  %852 = vmatpush.msra.mxu3 %v1871_v47  ;;  %v984_v51 = vsub.f32 %v982_v53, %v2114_v2 }
  0x78   :  { %545 = vmatmul.f32.gmra.mxu2 %v1956_v58  ;;  %698 = vmatpush.msra.mxu0 %v1963_v59  ;;  %v924_v58 = vld [vmem:[#allocation9 + $0x40] sm:$0xff] }
  0x79   :  { %734 = vmatpush.msra.mxu1 %v1871_v47  ;;  %809 = vmatpush.msra.mxu2 %v623_v23  ;;  %v2155_v5 = vand.u32 4294901760, %v924_v58 }
  0x7a   :  { %854 = vmatpush.msra.mxu3 %v1887_v57  ;;  %701 = vmatpush.msra.mxu0 %v1975_v46  ;;  %v923_v46 = vld [vmem:[#allocation9 + $0x38] sm:$0xff] }
  0x7b   :  { %650 = vmatmul.f32.gmra.mxu3 %v1854_v0  ;;  %736 = vmatpush.msra.mxu1 %v1887_v57  ;;  %v926_v57 = vld [vmem:[#allocation9 + $0x50] sm:$0xff]  ;;  %v1024_v40 = vsub.f32 %v924_v58, %v2155_v5  ;;  %v2165_v52 = vand.u32 4294901760, %v923_v46 }
  0x7c   :  { %813 = vmatpush.msra.mxu2 %v629_v25  ;;  %856 = vmatpush.msra.mxu3 %v1901_v36 }
  0x7d   :  { %704 = vmatmul.f32.vlgmr.msra.gmra.mxu0 %v1821_v13  ;;  %738 = vmatpush.msra.mxu1 %v1901_v36  ;;  %v928_v13 = vld [vmem:[#allocation9 + $0x60] sm:$0xff]  ;;  %v2171_v44 = vand.u32 4294901760, %v1024_v40  ;;  %v1030_v50 = vsub.f32 %v923_v46, %v2165_v52 }
  0x7e   :  { %817 = vmatpush.msra.mxu2 %v635_v33  ;;  %858 = vmatpush.msra.mxu3 %v1920_v9  ;;  %v2125_v16 = vand.u32 4294901760, %v928_v13  ;;  %v916_v46 = vld [vmem:[#allocation9] sm:$0xff] }
  0x7f   :  { %740 = vmatpush.msra.mxu1 %v1920_v9  ;;  %933 = vmatpush.msrb.mxu0 %v2107_v31  ;;  %v925_v9 = vld [vmem:[#allocation9 + $0x48] sm:$0xff]  ;;  %v1026_v37 = vsub.f32 %v1024_v40, %v2171_v44  ;;  %v2184_v55 = vand.u32 4294901760, %v1030_v50 }
  0x80   :  { %821 = vmatpush.msra.mxu2 %v641_v45  ;;  %860 = vmatpush.msra.mxu3 %v1938_v43  ;;  %v2147_v23 = vand.u32 4294901760, %v925_v9  ;;  %v922_v45 = vld [vmem:[#allocation9 + $0x30] sm:$0xff] }
  0x81   :  { %823 = vmatmul.f32.vlgmr.msra.gmra.mxu2 %v1795_v28  ;;  %742 = vmatpush.msra.mxu1 %v1938_v43  ;;  %v985_v43 = vand.u32 4294901760, %v984_v51  ;;  %v2173_v54 = vand.u32 4294901760, %v922_v45  ;;  %v1027_v24 = vand.u32 4294901760, %v1026_v37  ;;  %v1032_v27 = vsub.f32 %v1030_v50, %v2184_v55 }
  0x82   :  { %862 = vmatpush.msra.mxu3 %v1951_v62  ;;  %1088 = vmatpush.msrb.mxu2 %v982_v53  ;;  %v1018_v25 = vsub.f32 %v925_v9, %v2147_v23  ;;  %v919_v53 = vld [vmem:[#allocation9 + $0x18] sm:$0xff]  ;;  %v917_v9 = vld [vmem:[#allocation9 + $0x8] sm:$0xff] }
  0x83   :  { %864 = vmatmul.f32.vlgmr.msra.gmra.mxu3 %v1795_v28  ;;  %744 = vmatpush.msra.mxu1 %v1951_v62  ;;  %v929_v28 = vld [vmem:[#allocation9 + $0x68] sm:$0xff]  ;;  %v1036_v63 = vsub.f32 %v922_v45, %v2173_v54  ;;  %v2226_v45 = vand.u32 4294901760, %v916_v46 }
  0x84   :  { %748 = vmatmul.f32.vlgmr.msra.gmra.mxu1 %v1845_v60  ;;  %1146 = vmatpush.msrb.mxu3 %v2107_v31  ;;  %v2117_v32 = vand.u32 4294901760, %v929_v28  ;;  %v2122_v60 = vand.u32 4294901760, %v988_v48  ;;  %v2161_v33 = vand.u32 4294901760, %v1018_v25 }
  0x85   :  { %709 = vmatmul.f32.gmra.mxu0 %v1880_v3  ;;  %1091 = vmatpush.msrb.mxu2 %v988_v48  ;;  %v1000_v3 = vsub.f32 %v928_v13, %v2125_v16  ;;  %v2186_v21 = vand.u32 4294901760, %v1036_v63  ;;  %v2197_v13 = vand.u32 4294901760, %v919_v53 }
  0x86   :  { %1148 = vmatpush.msrb.mxu3 %v2110_v12  ;;  %935 = vmatpush.msrb.mxu0 %v2110_v12  ;;  %v994_v61 = vsub.f32 %v929_v28, %v2117_v32  ;;  %v990_v47 = vsub.f32 %v988_v48, %v2122_v60  ;;  %v1020_v41 = vsub.f32 %v1018_v25, %v2161_v33  ;;  %v2195_v48 = vand.u32 4294901760, %v1042_v38 }
  0x87   :  { %986 = vmatpush.msrb.mxu1 %v985_v43  ;;  %v2138_v36 = vand.u32 4294901760, %v1000_v3  ;;  %v1038_v28 = vsub.f32 %v1036_v63, %v2186_v21  ;;  %v918_v43 = vld [vmem:[#allocation9 + $0x10] sm:$0xff] }
  0x88   :  { %1150 = vmatpush.msrb.mxu3 %v2117_v32  ;;  %937 = vmatpush.msrb.mxu0 %v2117_v32  ;;  %v2130_v19 = vand.u32 4294901760, %v994_v61  ;;  %v991_v15 = vand.u32 4294901760, %v990_v47  ;;  %v1021_v17 = vand.u32 4294901760, %v1020_v41 }
  0x89   :  { %827 = vmatmul.f32.gmra.mxu2 %v1854_v0  ;;  %v1002_v6 = vsub.f32 %v1000_v3, %v2138_v36 }
  0x8a   :  { %1094 = vmatpush.msrb.mxu2 %v994_v61  ;;  %1152 = vmatpush.msrb.mxu3 %v2125_v16  ;;  %v996_v30 = vsub.f32 %v994_v61, %v2130_v19  ;;  %v1033_v61 = vand.u32 4294901760, %v1032_v27 }
  0x8b   :  { %868 = vmatmul.f32.gmra.mxu3 %v1854_v0  ;;  %v927_v0 = vld [vmem:[#allocation9 + $0x58] sm:$0xff]  ;;  %939 = vmatpush.msrb.mxu0 %v2125_v16  ;;  %v1003_v59 = vand.u32 4294901760, %v1002_v6 }
  0x8c   :  { %754 = vmatmul.f32.gmra.mxu1 %v1908_v22  ;;  %v2134_v20 = vand.u32 4294901760, %v927_v0  ;;  %1097 = vmatpush.msrb.mxu2 %v1000_v3  ;;  %v2140_v22 = vand.u32 4294901760, %v926_v57  ;;  %v997_v18 = vand.u32 4294901760, %v996_v30  ;;  %v1039_v3 = vand.u32 4294901760, %v1038_v28 }
  0x8d   :  { %992 = vmatpush.msrb.mxu1 %v991_v15  ;;  %v1054_v15 = vsub.f32 %v919_v53, %v2197_v13  ;;  %v2206_v30 = vand.u32 4294901760, %v918_v43 }
  0x8e   :  { %v1006_v4 = vsub.f32 %v927_v0, %v2134_v20  ;;  %1154 = vmatpush.msrb.mxu3 %v2134_v20  ;;  %941 = vmatpush.msrb.mxu0 %v2134_v20  ;;  %v1012_v11 = vsub.f32 %v926_v57, %v2140_v22  ;;  %v1048_v0 = vsub.f32 %v920_v8, %v2192_v49 }
  0x8f   :  { %998 = vmatpush.msrb.mxu1 %v997_v18  ;;  %v1044_v57 = vsub.f32 %v1042_v38, %v2195_v48  ;;  %v1060_v58 = vsub.f32 %v918_v43, %v2206_v30  ;;  %v1072_v8 = vsub.f32 %v916_v46, %v2226_v45 }
  0x90   :  { %v2149_v62 = vand.u32 4294901760, %v1006_v4  ;;  %1100 = vmatpush.msrb.mxu2 %v1006_v4  ;;  %1156 = vmatpush.msrb.mxu3 %v2140_v22  ;;  %v2152_v1 = vand.u32 4294901760, %v1012_v11 }
  0x91   :  { %943 = vmatpush.msrb.mxu0 %v2140_v22  ;;  %1004 = vmatpush.msrb.mxu1 %v1003_v59  ;;  %v1045_v6 = vand.u32 4294901760, %v1044_v57  ;;  %v2215_v59 = vand.u32 4294901760, %v917_v9 }
  0x92   :  { %v1008_v10 = vsub.f32 %v1006_v4, %v2149_v62  ;;  %1103 = vmatpush.msrb.mxu2 %v1012_v11  ;;  %1158 = vmatpush.msrb.mxu3 %v2147_v23  ;;  %v1014_v29 = vsub.f32 %v1012_v11, %v2152_v1  ;;  %v2210_v4 = vand.u32 4294901760, %v1048_v0  ;;  %v2212_v11 = vand.u32 4294901760, %v1054_v15 }
  0x93   :  { %945 = vmatpush.msrb.mxu0 %v2147_v23 }
  0x94   :  { %v1009_v14 = vand.u32 4294901760, %v1008_v10  ;;  %1106 = vmatpush.msrb.mxu2 %v1018_v25  ;;  %1160 = vmatpush.msrb.mxu3 %v2155_v5  ;;  %v1015_v39 = vand.u32 4294901760, %v1014_v29  ;;  %v1050_v10 = vsub.f32 %v1048_v0, %v2210_v4  ;;  %v2221_v29 = vand.u32 4294901760, %v1060_v58 }
  0x95   :  { %947 = vmatpush.msrb.mxu0 %v2155_v5 }
  0x96   :  { %1010 = vmatpush.msrb.mxu1 %v1009_v14  ;;  %1109 = vmatpush.msrb.mxu2 %v1024_v40  ;;  %v1066_v40 = vsub.f32 %v917_v9, %v2215_v59  ;;  %v1051_v14 = vand.u32 4294901760, %v1050_v10  ;;  %v1062_v56 = vsub.f32 %v1060_v58, %v2221_v29 }
  0x97   :  { %1162 = vmatpush.msrb.mxu3 %v2165_v52  ;;  %949 = vmatpush.msrb.mxu0 %v2165_v52 }
  0x98   :  { %1016 = vmatpush.msrb.mxu1 %v1015_v39  ;;  %1112 = vmatpush.msrb.mxu2 %v1030_v50 }
  0x99   :  { %1164 = vmatpush.msrb.mxu3 %v2173_v54  ;;  %951 = vmatpush.msrb.mxu0 %v2173_v54 }
  0x9a   :  { %1022 = vmatpush.msrb.mxu1 %v1021_v17  ;;  %1115 = vmatpush.msrb.mxu2 %v1036_v63  ;;  %v2233_v63 = vand.u32 4294901760, %v1066_v40 }
  0x9b   :  { %1166 = vmatpush.msrb.mxu3 %v2179_v7  ;;  %953 = vmatpush.msrb.mxu0 %v2179_v7 }
  0x9c   :  { %1028 = vmatpush.msrb.mxu1 %v1027_v24  ;;  %1118 = vmatpush.msrb.mxu2 %v1042_v38  ;;  %v1068_v24 = vsub.f32 %v1066_v40, %v2233_v63  ;;  %v2239_v38 = vand.u32 4294901760, %v1072_v8 }
  0x9d   :  { %1168 = vmatpush.msrb.mxu3 %v2192_v49  ;;  %955 = vmatpush.msrb.mxu0 %v2192_v49 }
  0x9e   :  { %1034 = vmatpush.msrb.mxu1 %v1033_v61  ;;  %1121 = vmatpush.msrb.mxu2 %v1048_v0  ;;  %v1069_v28 = vand.u32 4294901760, %v1068_v24 }
  0x9f   :  { %1170 = vmatpush.msrb.mxu3 %v2197_v13  ;;  %957 = vmatpush.msrb.mxu0 %v2197_v13 }
  0xa0   :  { %1040 = vmatpush.msrb.mxu1 %v1039_v3  ;;  %1124 = vmatpush.msrb.mxu2 %v1054_v15 }
  0xa1   :  { %1172 = vmatpush.msrb.mxu3 %v2206_v30  ;;  %959 = vmatpush.msrb.mxu0 %v2206_v30 }
  0xa2   :  { %1046 = vmatpush.msrb.mxu1 %v1045_v6  ;;  %1127 = vmatpush.msrb.mxu2 %v1060_v58 }
  0xa3   :  { %1174 = vmatpush.msrb.mxu3 %v2215_v59  ;;  %961 = vmatpush.msrb.mxu0 %v2215_v59 }
  0xa4   :  { %1052 = vmatpush.msrb.mxu1 %v1051_v14  ;;  %1130 = vmatpush.msrb.mxu2 %v1066_v40 }
  0xa5   :  { %1176 = vmatpush.msrb.mxu3 %v2226_v45  ;;  %963 = vmatpush.msrb.mxu0 %v2226_v45 }
  0xa6   :  { %1133 = vmatpush.msrb.mxu2 %v1072_v8 }
  0xa7   :  { %1360 = vmatpush.msra.mxu3 %v2107_v31  ;;  %1193 = vmatpush.msra.mxu0 %v2114_v2 }
  0xa8   :  { %1344 = vmatpush.msra.mxu2 %v2114_v2 }
  0xa9   :  { %1361 = vmatpush.msra.mxu3 %v2110_v12  ;;  %1197 = vmatpush.msra.mxu0 %v2122_v60 }
  0xaa   :  { %1345 = vmatpush.msra.mxu2 %v2122_v60 }
  0xab   :  { %1362 = vmatpush.msra.mxu3 %v2117_v32  ;;  %1201 = vmatpush.msra.mxu0 %v2130_v19 }
  0xac   :  { %1346 = vmatpush.msra.mxu2 %v2130_v19 }
  0xad   :  { %1363 = vmatpush.msra.mxu3 %v2125_v16  ;;  %1205 = vmatpush.msra.mxu0 %v2138_v36 }
  0xae   :  { %1347 = vmatpush.msra.mxu2 %v2138_v36 }
  0xaf   :  { %1364 = vmatpush.msra.mxu3 %v2134_v20  ;;  %1209 = vmatpush.msra.mxu0 %v2149_v62 }
  0xb0   :  { %1348 = vmatpush.msra.mxu2 %v2149_v62 }
  0xb1   :  { %1365 = vmatpush.msra.mxu3 %v2140_v22  ;;  %1213 = vmatpush.msra.mxu0 %v2152_v1 }
  0xb2   :  { %1349 = vmatpush.msra.mxu2 %v2152_v1 }
  0xb3   :  { %1366 = vmatpush.msra.mxu3 %v2147_v23  ;;  %1217 = vmatpush.msra.mxu0 %v2161_v33 }
  0xb4   :  { %1350 = vmatpush.msra.mxu2 %v2161_v33 }
  0xb5   :  { %1367 = vmatpush.msra.mxu3 %v2155_v5  ;;  %1221 = vmatpush.msra.mxu0 %v2171_v44 }
  0xb6   :  { %1351 = vmatpush.msra.mxu2 %v2171_v44  ;;  %v125_v44 = vperm.slane %v2168_v34, 1 }
  0xb7   :  { %1368 = vmatpush.msra.mxu3 %v2165_v52  ;;  %1225 = vmatpush.msra.mxu0 %v2184_v55 }
  0xb8   :  { %1352 = vmatpush.msra.mxu2 %v2184_v55 }
  0xb9   :  { %1369 = vmatpush.msra.mxu3 %v2173_v54  ;;  %1229 = vmatpush.msra.mxu0 %v2186_v21 }
  0xba   :  { %1353 = vmatpush.msra.mxu2 %v2186_v21 }
  0xbb   :  { %1370 = vmatpush.msra.mxu3 %v2179_v7  ;;  %1233 = vmatpush.msra.mxu0 %v2195_v48 }
  0xbc   :  { %1354 = vmatpush.msra.mxu2 %v2195_v48 }
  0xbd   :  { %1371 = vmatpush.msra.mxu3 %v2192_v49  ;;  %1237 = vmatpush.msra.mxu0 %v2210_v4 }
  0xbe   :  { %1355 = vmatpush.msra.mxu2 %v2210_v4 }
  0xbf   :  { %1372 = vmatpush.msra.mxu3 %v2197_v13  ;;  %1241 = vmatpush.msra.mxu0 %v2212_v11 }
  0xc0   :  { %1356 = vmatpush.msra.mxu2 %v2212_v11 }
  0xc1   :  { %v166_v26 = vpop.f32.mrf.mxu0  ;;  %1373 = vmatpush.msra.mxu3 %v2206_v30  ;;  %1245 = vmatpush.msra.mxu0 %v2221_v29 }
  0xc2   :  { %v167_v51 = vadd.f32 %v166_v26, %v124_v42  ;;  %v1056_v26 = vsub.f32 %v1054_v15, %v2212_v11  ;;  %1357 = vmatpush.msra.mxu2 %v2221_v29 }
  0xc3   :  { %1374 = vmatpush.msra.mxu3 %v2215_v59  ;;  %1249 = vmatpush.msra.mxu0 %v2233_v63 }
  0xc4   :  { %v1057_v50 = vand.u32 4294901760, %v1056_v26  ;;  %1358 = vmatpush.msra.mxu2 %v2233_v63 }
  0xc5   :  { %1375 = vmatpush.msra.mxu3 %v2226_v45  ;;  %1253 = vmatpush.msra.mxu0 %v2239_v38 }
  0xc6   :  { %1058 = vmatpush.msrb.mxu1 %v1057_v50  ;;  %1359 = vmatpush.msra.mxu2 %v2239_v38 }
  0xc9   :  { %v275_v35 = vpop.f32.mrf.mxu1 }
  0xca   :  { %v276_v25 = vadd.f32 %v275_v35, %v167_v51  ;;  %v1063_v35 = vand.u32 4294901760, %v1062_v56  ;;  %v1074_v51 = vsub.f32 %v1072_v8, %v2239_v38 }
  0xcc   :  { %1064 = vmatpush.msrb.mxu1 %v1063_v35  ;;  %v1075_v0 = vand.u32 4294901760, %v1074_v51 }
  0xcd   :  { %v174_v47 = vpop.f32.mrf.mxu0 }
  0xce   :  { %v175_v17 = vadd.f32 %v174_v47, %v124_v42  ;;  %1070 = vmatpush.msrb.mxu1 %v1069_v28 }
  0xd0   :  { %1076 = vmatpush.msrb.mxu1 %v1075_v0 }
  0xd1   :  { %v333_v18 = vpop.f32.mrf.mxu2 }
  0xd2   :  { %v334_v37 = vadd.f32 %v333_v18, %v276_v25  ;;  %1264 = vmatpush.msra.mxu1 %v2107_v31 }
  0xd4   :  { %v279_v39 = vpop.f32.mrf.mxu1  ;;  %v377_v41 = vpop.f32.mrf.mxu3  ;;  %1266 = vmatpush.msra.mxu1 %v2110_v12 }
  0xd5   :  { %v280_v42 = vadd.f32 %v279_v39, %v175_v17  ;;  %v378_v53 = vadd.f32 %v377_v41, %v334_v37 }
  0xd6   :  { %1268 = vmatpush.msra.mxu1 %v2117_v32 }
  0xd8   :  { %v452_v27 = vpop.f32.mrf.mxu0  ;;  %1270 = vmatpush.msra.mxu1 %v2125_v16 }
  0xd9   :  { %v453_v43 = vadd.f32 %v452_v27, %v378_v53 }
  0xda   :  { %1272 = vmatpush.msra.mxu1 %v2134_v20 }
  0xdb   :  { %v338_v61 = vpop.f32.mrf.mxu2 }
  0xdc   :  { %v339_v47 = vadd.f32 %v338_v61, %v280_v42  ;;  %1274 = vmatpush.msra.mxu1 %v2140_v22 }
  0xde   :  { %v383_v2 = vpop.f32.mrf.mxu3  ;;  %1276 = vmatpush.msra.mxu1 %v2147_v23 }
  0xdf   :  { %v493_v3 = vpop.f32.mrf.mxu1  ;;  %v384_v15 = vadd.f32 %v383_v2, %v339_v47 }
  0xe0   :  { %v2253_v57 = vadd.f32 %v493_v3, %v453_v43  ;;  %1278 = vmatpush.msra.mxu1 %v2155_v5 }
  0xe2   :  { %v1342_v60 = vmul.f32 -1.442695, %v2253_v57  ;;  %1280 = vmatpush.msra.mxu1 %v2165_v52 }
  0xe3   :  { %v456_v31 = vpop.f32.mrf.mxu0 }
  0xe4   :  { %1386 = vpow2.f32 %v1342_v60  ;;  %v457_v12 = vadd.f32 %v456_v31, %v384_v15  ;;  %1282 = vmatpush.msra.mxu1 %v2173_v54 }
  0xe6   :  { %1284 = vmatpush.msra.mxu1 %v2179_v7 }
  0xe7   :  { %v497_v19 = vpop.f32.mrf.mxu1 }
  0xe8   :  { %v2272_v32 = vadd.f32 %v497_v19, %v457_v12  ;;  %1286 = vmatpush.msra.mxu1 %v2192_v49 }
  0xea   :  { %v1387_v16 = vpop.eup %1386  ;;  %v1343_v36 = vmul.f32 -1.442695, %v2272_v32  ;;  %1288 = vmatpush.msra.mxu1 %v2197_v13 }
  0xeb   :  { %v2281_v20 = vadd.f32 1.0, %v1387_v16 }
  0xec   :  { %1388 = vpow2.f32 %v1343_v36  ;;  %1290 = vmatpush.msra.mxu1 %v2206_v30 }
  0xed   :  { %1390 = vrcp.f32 %v2281_v20  ;;  %v891_v13 = vand.u32 2147483648, %v2281_v20  ;;  %vm885_vm1 = vweird.f32 %v2281_v20  ;;  %v889_v30 = vand.u32 2147483647, %v2281_v20 }
  0xee   :  { %1292 = vmatpush.msra.mxu1 %v2215_v59 }
  0xef   :  { %v892_v25 = vor.u32 1.1754944e-38, %v891_v13  ;;  %vm890_vm3 = vcmp.eq.f32.partialorder %v889_v30, 8.507059e+37 }
  0xf0   :  { %1294 = vmatpush.msra.mxu1 %v2226_v45 }
  0xf2   :  { %v1389_v22 = vpop.eup %1388  ;;  %v538_v23 = vpop.f32.mrf.mxu2 }
  0xf3   :  { %v1391_v62 = vpop.eup %1390  ;;  %v2300_v1 = vadd.f32 1.0, %v1389_v22  ;;  %v539_v7 = vadd.f32 %v538_v23, %v125_v44 }
  0xf4   :  { %v881_v5 = vmul.f32 %v1391_v62, %v2281_v20  ;;  %vm886_vm0 = vweird.f32 %v1391_v62 }
  0xf5   :  { %1392 = vrcp.f32 %v2300_v1  ;;  %v647_v33 = vpop.f32.mrf.mxu3  ;;  %vm887_vm2 = vmor %vm885_vm1, %vm886_vm0  ;;  %v906_v39 = vand.u32 2147483648, %v2300_v1  ;;  %vm900_vm5 = vweird.f32 %v2300_v1  ;;  %v904_v17 = vand.u32 2147483647, %v2300_v1 }
  0xf6   :  { %v882_v52 = vsub.f32 1.0, %v881_v5  ;;  %v648_v9 = vadd.f32 %v647_v33, %v539_v7 }
  0xf7   :  { %v907_v38 = vor.u32 1.1754944e-38, %v906_v39  ;;  %vm905_vm7 = vcmp.eq.f32.partialorder %v904_v17, 8.507059e+37 }
  0xf8   :  { %v883_v54 = vmul.f32 %v1391_v62, %v882_v52 }
  0xfa   :  { %v705_v21 = vpop.f32.mrf.mxu0  ;;  %v884_v48 = vadd.f32 %v1391_v62, %v883_v54 }
  0xfb   :  { %v1393_v55 = vpop.eup %1392  ;;  %v546_v49 = vpop.f32.mrf.mxu2  ;;  %v706_v6 = vadd.f32 %v705_v21, %v648_v9 }
  0xfc   :  { %v896_v34 = vmul.f32 %v1393_v55, %v2300_v1  ;;  %v888_v11 = vsel %vm887_vm2, %v1391_v62, %v884_v48  ;;  %v547_v10 = vadd.f32 %v546_v49, %v125_v44  ;;  %vm901_vm4 = vweird.f32 %v1393_v55 }
  0xfd   :  { %v893_v26 = vsel %vm890_vm3, %v892_v25, %v888_v11  ;;  %vm902_vm6 = vmor %vm900_vm5, %vm901_vm4 }
  0xfe   :  { %v897_v4 = vsub.f32 1.0, %v896_v34  ;;  %v651_v18 = vpop.f32.mrf.mxu3  ;;  %v910_v56 = vmul.f32 %v893_v26, %v2253_v57  ;;  %v1385_v34 = vld [vmem:[%s2342_s4] ss:$0 sm:$0xff] }
  0xff   :  { %v652_v41 = vadd.f32 %v651_v18, %v547_v10 }
 0x100   :  { %v898_v58 = vmul.f32 %v1393_v55, %v897_v4 }
 0x101   :  { %v749_v59 = vpop.f32.mrf.mxu1 }
 0x102   :  { %v750_v46 = vadd.f32 %v749_v59, %v706_v6  ;;  %v899_v40 = vadd.f32 %v1393_v55, %v898_v58  ;;  %v710_v14 = vpop.f32.mrf.mxu0 }
 0x103   :  { %v711_v63 = vadd.f32 %v710_v14, %v652_v41 }
 0x104   :  { %v824_v29 = vpop.f32.mrf.mxu2  ;;  %v903_v8 = vsel %vm902_vm6, %v1393_v55, %v899_v40 }
 0x105   :  { %v825_v45 = vadd.f32 %v824_v29, %v750_v46  ;;  %v908_v53 = vsel %vm905_vm7, %v907_v38, %v903_v8 }
 0x106   :  { %v865_v50 = vpop.f32.mrf.mxu3  ;;  %v911_v43 = vmul.f32 %v908_v53, %v2272_v32 }
 0x107   :  { %v866_v37 = vadd.f32 %v865_v50, %v825_v45 }
 0x109   :  { %v912_v35 = vmul.f32 %v910_v56, %v866_v37  ;;  %v755_v24 = vpop.f32.mrf.mxu1 }
 0x10a   :  { %v756_v27 = vadd.f32 %v755_v24, %v711_v63 }
 0x10b   :  { %v964_v42 = vand.u32 4294901760, %v912_v35 }
 0x10c   :  { %v828_v28 = vpop.f32.mrf.mxu2 }
 0x10d   :  { %v965_v51 = vsub.f32 %v912_v35, %v964_v42  ;;  %v829_v61 = vadd.f32 %v828_v28, %v756_v27  ;;  %1078 = vmatmul.f32.vlgmr.msrb.gmra.mxu1 %v964_v42 }
 0x10e   :  { %v869_v0 = vpop.f32.mrf.mxu3 }
 0x10f   :  { %v870_v47 = vadd.f32 %v869_v0, %v829_v61  ;;  %1136 = vmatmul.f32.vlgmr.msrb.gmra.mxu2 %v965_v51  ;;  %v966_v3 = vand.u32 4294901760, %v965_v51 }
 0x111   :  { %v913_v2 = vmul.f32 %v911_v43, %v870_v47  ;;  %1180 = vmatmul.f32.vlgmr.msrb.gmra.mxu3 %v966_v3  ;;  %v967_v57 = vsub.f32 %v965_v51, %v966_v3 }
 0x113   :  { %v972_v60 = vand.u32 4294901760, %v913_v2  ;;  %v968_v15 = vand.u32 4294901760, %v967_v57 }
 0x115   :  { %969 = vmatmul.f32.vlgmr.msrb.gmra.mxu0 %v968_v15  ;;  %1082 = vmatmul.f32.gmra.mxu1 %v972_v60  ;;  %v973_v31 = vsub.f32 %v913_v2, %v972_v60 }
 0x117   :  { %1141 = vmatmul.f32.gmra.mxu2 %v973_v31  ;;  %v974_v12 = vand.u32 4294901760, %v973_v31 }
 0x119   :  { %1186 = vmatmul.f32.gmra.mxu3 %v974_v12  ;;  %v975_v19 = vsub.f32 %v973_v31, %v974_v12 }
 0x11b   :  { %v976_v16 = vand.u32 4294901760, %v975_v19 }
 0x11d   :  { %977 = vmatmul.f32.gmra.mxu0 %v976_v16  ;;  %1296 = vmatmul.f32.vlgmr.msra.gmra.mxu1 %v964_v42 }
 0x11f   :  { %1259 = vmatmul.f32.vlgmr.msra.gmra.mxu2 %v972_v60 }
 0x121   :  { %1300 = vmatmul.f32.vlgmr.msra.gmra.mxu3 %v972_v60 }
 0x125   :  { %1255 = vmatmul.f32.vlgmr.msra.gmra.mxu0 %v964_v42 }
 0x18a   :  { %v1079_v32 = vpop.f32.mrf.mxu1 }
 0x192   :  { %v970_v36 = vpop.f32.mrf.mxu0  ;;  %v1137_v20 = vpop.f32.mrf.mxu2 }
 0x193   :  { %v1080_v23 = vadd.f32 %v1079_v32, %v970_v36  ;;  %v1083_v62 = vpop.f32.mrf.mxu1 }
 0x194   :  { %v1181_v22 = vpop.f32.mrf.mxu3 }
 0x195   :  { %v1138_v44 = vadd.f32 %v1137_v20, %v1080_v23 }
 0x197   :  { %v1182_v7 = vadd.f32 %v1181_v22, %v1138_v44 }
 0x19a   :  { %v978_v1 = vpop.f32.mrf.mxu0  ;;  %v1142_v33 = vpop.f32.mrf.mxu2 }
 0x19b   :  { %v1084_v5 = vadd.f32 %v1083_v62, %v978_v1  ;;  %v1297_v13 = vpop.f32.mrf.mxu1 }
 0x19c   :  { %v1187_v52 = vpop.f32.mrf.mxu3 }
 0x19d   :  { %v1143_v54 = vadd.f32 %v1142_v33, %v1084_v5 }
 0x19f   :  { %v1188_v55 = vadd.f32 %v1187_v52, %v1143_v54 }
 0x1a2   :  { %v1256_v21 = vpop.f32.mrf.mxu0  ;;  %v1260_v48 = vpop.f32.mrf.mxu2 }
 0x1a3   :  { %v1257_v49 = vadd.f32 %v1256_v21, %v1182_v7  ;;  %v1261_v4 = vadd.f32 %v1260_v48, %v1188_v55 }
 0x1a4   :  { %v1301_v9 = vpop.f32.mrf.mxu3 }
 0x1a5   :  { %v1298_v18 = vadd.f32 %v1297_v13, %v1257_v49  ;;  %v1302_v30 = vadd.f32 %v1301_v9, %v1261_v4 }
 0x1a7   :  { %v1317_v6 = vadd.f32 %v1385_v34, %v1298_v18  ;;  %v1318_v11 = vadd.f32 %v1385_v34, %v1302_v30 }
 0x1a9   :  { %1319 = vst [vmem:[#allocation11] sm:$0xff] %v1317_v6 }
 0x1aa   :  { %1320 = vst [vmem:[#allocation11 + $0x8] sm:$0xff] %v1318_v11 }
 0x1ab   :  { %1333 = dma.vmem_to_hbm [thread:$0]  %s1326_s16, 256, %s1328_s19, [#allocation5], %s1526_s30, %s1526_s30, %s1527_s6  }
 0x1ac   :  { %1520 = dma.done.wait [#allocation5], 256  }
 0x1ad   :  { %1521 = vsyncadd [#allocation5], 4294967040 }
 0x1ae   :  { %1338 = vsyncpa [#allocation4], 1 }
 0x1af   :  { %1339 = vsyncpa [#allocation7], 1 }
 0x1b0   :  { %1340 = vsyncpa [#allocation10], 1 }
 0x1b1   :  { %1341 = vsyncpa [#allocation5], 1 }

</bundles_post_ra>
